<compile_context>
chip_gen: v7x
topology: tpu7x:2x2x1
jax: 0.10.0
libtpu: 0.0.40
codegen_flags: <defaults>
</compile_context>

<pallas_src>
import functools

import numpy as np
import jax
import jax.numpy as jnp
from jax.experimental import pallas as pl
from jax.experimental.pallas import tpu as pltpu


def _cdiv(a: int, b: int) -> int:
    return -(-a // b)


def _pascal_row(kernel_size: int) -> np.ndarray:
    """Normalized 1-D binomial row; outer(row, row) == kornia's 2D Pascal kernel."""
    row = np.array([1.0], dtype=np.float64)
    for _ in range(kernel_size - 1):
        row = np.convolve(row, [1.0, 1.0])
    return (row / row.sum()).astype(np.float32)


def _pick_n_block(n: int, h: int, w: int, ho: int, wo: int,
                  in_item: int, out_item: int,
                  budget_bytes: int = 16 * 1024 * 1024,
                  min_steps: int = 4) -> int:
    """Planes per grid step: largest block whose full per-step VMEM residency
    (double-buffered input + output + f32 acc working set) fits the budget,
    while keeping >= min_steps grid steps so both v7x TensorCores pipeline."""
    per_plane = (2 * h * w * in_item          # input block, double buffered
                 + 2 * ho * wo * out_item     # output block, double buffered
                 + ho * w * 4)                # f32 accumulator working set
    cap = max(1, budget_bytes // max(per_plane, 1))
    target = max(1, _cdiv(n, min_steps))
    return max(1, min(cap, target))


def _blurpool_kernel(x_ref, sel_ref, o_ref, *,
                     vk, k, stride, pad, h, w, wo,
                     boundary_rows, interior, chunk):
    """One grid step: N_BLK (H, W) planes -> N_BLK (Ho, Wo) planes.

    Vertical binomial taps on the VPU (k strided sublane reads + f32 FMAs);
    horizontal taps + column stride + left/right zero padding folded into the
    (W, wo) `sel` matmul on the MXU.  Borders never touch a padded scratch.
    """
    nb = x_ref.shape[0]
    sel = sel_ref[...]                          # (w, wo) f32, hoisted constant

    # ---- interior output rows: every vertical tap is in-bounds ------------
    if interior is not None:
        lo, hi = interior
        for c0 in range(lo, hi + 1, chunk):
            cnt = min(chunk, hi + 1 - c0)
            acc = jnp.zeros((nb, cnt, w), jnp.float32)
            for i in range(k):
                start = c0 * stride + i - pad           # static, >= 0 by construction
                if stride == 1:
                    rows = x_ref[:, pl.ds(start, cnt), :]
                else:
                    rows = x_ref[:, pl.ds(start, cnt, stride=stride), :]
                acc = acc + float(vk[i]) * rows.astype(jnp.float32)
            out = jnp.dot(acc.reshape(nb * cnt, w), sel,
                          preferred_element_type=jnp.float32)
            o_ref[:, c0:c0 + cnt, :] = out.reshape(nb, cnt, wo).astype(o_ref.dtype)

    # ---- boundary output rows (top/bottom zero padding): drop the taps ----
    for r in boundary_rows:
        acc_r = jnp.zeros((nb, w), jnp.float32)
        for i in range(k):
            hrow = r * stride + i - pad
            if 0 <= hrow < h:                           # static tap validity
                acc_r = acc_r + float(vk[i]) * x_ref[:, hrow, :].astype(jnp.float32)
        out_r = jnp.dot(acc_r, sel, preferred_element_type=jnp.float32)
        o_ref[:, r, :] = out_r.astype(o_ref.dtype)


def blur_pool_2d(x, kernel_size: int = 3, stride: int = 2):
    """BlurPool2D forward. x: (B, C, H, W) -> (B, C, Ho, Wo)."""
    B, C, H, W = x.shape
    k = int(kernel_size)
    s = int(stride)
    pad = k // 2
    ho = (H + 2 * pad - k) // s + 1
    wo = (W + 2 * pad - k) // s + 1

    vk = _pascal_row(k)                                 # normalized 1-D taps

    # Horizontal taps + column stride + left/right zero padding folded into a
    # single (W, wo) matrix, built once on the host, DMA'd once (constant
    # index_map) and applied on the MXU.
    sel_np = np.zeros((W, wo), np.float32)
    for c in range(wo):
        for j in range(k):
            w_in = c * s + j - pad
            if 0 <= w_in < W:
                sel_np[w_in, c] = vk[j]
    sel = jnp.asarray(sel_np)

    n = B * C
    x3 = x.reshape(n, H, W)                             # contiguous -> free reshape
    item = jnp.dtype(x.dtype).itemsize
    n_blk = _pick_n_block(n, H, W, ho, wo, item, item)
    n_pad = _cdiv(n, n_blk) * n_blk
    if n_pad != n:                                      # awkward B*C: pad, don't shrink
        x3 = jnp.pad(x3, ((0, n_pad - n), (0, 0), (0, 0)))

    # Static split of output rows: interior rows have all k vertical taps
    # in-bounds; the few top/bottom boundary rows handle the zero padding by
    # dropping out-of-range taps.
    interior_lo = min(_cdiv(pad, s), ho)                # first r with r*s >= pad
    interior_hi = min((H - k + pad) // s, ho - 1)       # last r with r*s + k-1-pad <= H-1
    if interior_hi < interior_lo:
        interior = None
        boundary_rows = tuple(range(ho))
    else:
        interior = (interior_lo, interior_hi)
        boundary_rows = (tuple(range(0, interior_lo))
                         + tuple(range(interior_hi + 1, ho)))

    # Chunk interior rows so the f32 accumulator stays ~vreg-resident, with a
    # cap on the number of (unrolled) chunks and 8-row alignment so the
    # (nb, cnt, w) -> (nb*cnt, w) merge before the matmul is layout-free.
    if interior is not None:
        n_int = interior[1] - interior[0] + 1
        chunk = max(1, (64 * 1024) // (n_blk * W * 4))
        chunk = max(chunk, _cdiv(n_int, 16))
        if chunk >= 8:
            chunk -= chunk % 8
        chunk = min(chunk, n_int)
    else:
        chunk = 1

    kernel_fn = functools.partial(
        _blurpool_kernel, vk=vk, k=k, stride=s, pad=pad, h=H, w=W, wo=wo,
        boundary_rows=boundary_rows, interior=interior, chunk=chunk)

    out3 = pl.pallas_call(
        kernel_fn,
        out_shape=jax.ShapeDtypeStruct((n_pad, ho, wo), x.dtype),
        grid=(n_pad // n_blk,),
        in_specs=[
            pl.BlockSpec((n_blk, H, W), lambda i: (i, 0, 0)),
            pl.BlockSpec((W, wo), lambda i: (0, 0)),     # hoisted constant
        ],
        out_specs=pl.BlockSpec((n_blk, ho, wo), lambda i: (i, 0, 0)),
        compiler_params=pltpu.CompilerParams(
            dimension_semantics=("parallel",),
            vmem_limit_bytes=48 * 1024 * 1024),
    )(x3, sel)

    if n_pad != n:
        out3 = out3[:n]
    return out3.reshape(B, C, ho, wo)


def _reference_blur_pool_2d(x, kernel_size: int = 3, stride: int = 2):
    """Pure-JAX reference mirroring F.conv2d(..., padding=k//2, groups=C)."""
    B, C, H, W = x.shape
    pad = kernel_size // 2
    row = _pascal_row(kernel_size)
    wk = jnp.asarray(np.outer(row, row), dtype=x.dtype)
    weight = jnp.tile(wk[None, None], (C, 1, 1, 1))      # (C, 1, k, k)
    return jax.lax.conv_general_dilated(
        x, weight,
        window_strides=(stride, stride),
        padding=((pad, pad), (pad, pad)),
        dimension_numbers=("NCHW", "OIHW", "NCHW"),
        feature_group_count=C)


if __name__ == "__main__":
    key = jax.random.PRNGKey(0)

    # Main check: (2, 4, 16, 16), k=3, stride=2 against a conv reference.
    x = jax.random.normal(key, (2, 4, 16, 16), dtype=jnp.float32)
    out = jax.block_until_ready(blur_pool_2d(x, kernel_size=3, stride=2))
    ref = jax.block_until_ready(_reference_blur_pool_2d(x, kernel_size=3, stride=2))
    assert out.shape == (2, 4, 8, 8), out.shape
    np.testing.assert_allclose(np.asarray(out), np.asarray(ref), rtol=1e-5, atol=1e-5)

    # kornia BlurPool2D docstring example: eye(5)[None, None], k=3, stride=2.
    eye = jnp.eye(5, dtype=jnp.float32)[None, None]
    out_eye = jax.block_until_ready(blur_pool_2d(eye, kernel_size=3, stride=2))
    expected = np.array([[0.3125, 0.0625, 0.0000],
                         [0.0625, 0.3750, 0.0625],
                         [0.0000, 0.0625, 0.3125]], dtype=np.float32)
    np.testing.assert_allclose(np.asarray(out_eye)[0, 0], expected,
                               rtol=1e-5, atol=1e-6)

    # Generality check: odd spatial size, k=5 (exercises both top and bottom
    # boundary-row paths and the N-padding-free n_blk=2 tiling).
    x2 = jax.random.normal(jax.random.PRNGKey(1), (2, 3, 13, 13), dtype=jnp.float32)
    out2 = jax.block_until_ready(blur_pool_2d(x2, kernel_size=5, stride=2))
    ref2 = jax.block_until_ready(_reference_blur_pool_2d(x2, kernel_size=5, stride=2))
    np.testing.assert_allclose(np.asarray(out2), np.asarray(ref2), rtol=1e-5, atol=1e-5)

    print("KERNEL_OK")
</pallas_src>

<mosaic_0001>
module attributes {stable_mosaic.version = 11 : i64} {
  func.func @_blurpool_kernel(%arg0: i32, %arg1: memref<2x16x16xf32, #tpu.memory_space<vmem>>, %arg2: memref<16x8xf32, #tpu.memory_space<vmem>>, %arg3: memref<2x8x8xf32, #tpu.memory_space<vmem>>) attributes {dimension_semantics = [#tpu.dimension_semantics<parallel>], iteration_bounds = array<i64: 4>, scalar_prefetch = 0 : i64, scratch_operands = 0 : i64, tpu.core_type = #tpu.core_type<tc>, window_params = [{transform_indices = @transform_0, window_bounds = array<i64: 2, 16, 16>}, {pipeline_mode = #tpu.pipeline_mode<synchronous>, transform_indices = @transform_1, window_bounds = array<i64: 16, 8>}, {transform_indices = @transform_2, window_bounds = array<i64: 2, 8, 8>}]} {
    %c0 = arith.constant 0 : index
    %c0_0 = arith.constant 0 : index
    %0 = vector.load %arg2[%c0, %c0_0] : memref<16x8xf32, #tpu.memory_space<vmem>>, vector<16x8xf32>
    %cst = arith.constant 0.000000e+00 : f32
    %1 = vector.broadcast %cst : f32 to vector<2x7x16xf32>
    %c0_1 = arith.constant 0 : index
    %c1 = arith.constant 1 : index
    %c0_2 = arith.constant 0 : index
    %2 = tpu.strided_load %arg1[%c0_1, %c1, %c0_2] {strides = array<i32: 1, 2, 1>} : memref<2x16x16xf32, #tpu.memory_space<vmem>>, vector<2x7x16xf32>
    %cst_3 = arith.constant 2.500000e-01 : f32
    %3 = vector.broadcast %cst_3 : f32 to vector<2x7x16xf32>
    %4 = arith.mulf %3, %2 : vector<2x7x16xf32>
    %5 = arith.addf %1, %4 : vector<2x7x16xf32>
    %c0_4 = arith.constant 0 : index
    %c2 = arith.constant 2 : index
    %c0_5 = arith.constant 0 : index
    %6 = tpu.strided_load %arg1[%c0_4, %c2, %c0_5] {strides = array<i32: 1, 2, 1>} : memref<2x16x16xf32, #tpu.memory_space<vmem>>, vector<2x7x16xf32>
    %cst_6 = arith.constant 5.000000e-01 : f32
    %7 = vector.broadcast %cst_6 : f32 to vector<2x7x16xf32>
    %8 = arith.mulf %7, %6 : vector<2x7x16xf32>
    %9 = arith.addf %5, %8 : vector<2x7x16xf32>
    %c0_7 = arith.constant 0 : index
    %c3 = arith.constant 3 : index
    %c0_8 = arith.constant 0 : index
    %10 = tpu.strided_load %arg1[%c0_7, %c3, %c0_8] {strides = array<i32: 1, 2, 1>} : memref<2x16x16xf32, #tpu.memory_space<vmem>>, vector<2x7x16xf32>
    %cst_9 = arith.constant 2.500000e-01 : f32
    %11 = vector.broadcast %cst_9 : f32 to vector<2x7x16xf32>
    %12 = arith.mulf %11, %10 : vector<2x7x16xf32>
    %13 = arith.addf %9, %12 : vector<2x7x16xf32>
    %14 = vector.shape_cast %13 : vector<2x7x16xf32> to vector<14x16xf32>
    %cst_10 = arith.constant dense<0.000000e+00> : vector<14x8xf32>
    %15 = tpu.matmul %14, %0, %cst_10 {dimension_numbers = #tpu.dot_dimension_numbers<[1], [0], [0], [1], [0, 0, 1, 1], [], []>} : vector<14x16xf32>, vector<16x8xf32>, vector<14x8xf32> -> vector<14x8xf32>
    %16 = vector.shape_cast %15 : vector<14x8xf32> to vector<2x7x8xf32>
    %c0_11 = arith.constant 0 : index
    %c1_12 = arith.constant 1 : index
    %c0_13 = arith.constant 0 : index
    %17 = vector.load %arg3[%c0_11, %c1_12, %c0_13] : memref<2x8x8xf32, #tpu.memory_space<vmem>>, vector<2x7x8xf32>
    tpu.vector_store %arg3[%c0_11, %c1_12, %c0_13], %16 {strides = array<i32>} : memref<2x8x8xf32, #tpu.memory_space<vmem>>, vector<2x7x8xf32>,
    %cst_14 = arith.constant 0.000000e+00 : f32
    %18 = vector.broadcast %cst_14 : f32 to vector<2x16xf32>
    %c0_15 = arith.constant 0 : index
    %c0_16 = arith.constant 0 : index
    %c0_17 = arith.constant 0 : index
    %19 = vector.load %arg1[%c0_15, %c0_16, %c0_17] : memref<2x16x16xf32, #tpu.memory_space<vmem>>, vector<2x1x16xf32>
    %20 = vector.shape_cast %19 : vector<2x1x16xf32> to vector<2x16xf32>
    %cst_18 = arith.constant 5.000000e-01 : f32
    %21 = vector.broadcast %cst_18 : f32 to vector<2x16xf32>
    %22 = arith.mulf %21, %20 : vector<2x16xf32>
    %23 = arith.addf %18, %22 : vector<2x16xf32>
    %c0_19 = arith.constant 0 : index
    %c1_20 = arith.constant 1 : index
    %c0_21 = arith.constant 0 : index
    %24 = vector.load %arg1[%c0_19, %c1_20, %c0_21] : memref<2x16x16xf32, #tpu.memory_space<vmem>>, vector<2x1x16xf32>
    %25 = vector.shape_cast %24 : vector<2x1x16xf32> to vector<2x16xf32>
    %cst_22 = arith.constant 2.500000e-01 : f32
    %26 = vector.broadcast %cst_22 : f32 to vector<2x16xf32>
    %27 = arith.mulf %26, %25 : vector<2x16xf32>
    %28 = arith.addf %23, %27 : vector<2x16xf32>
    %cst_23 = arith.constant dense<0.000000e+00> : vector<2x8xf32>
    %29 = tpu.matmul %28, %0, %cst_23 {dimension_numbers = #tpu.dot_dimension_numbers<[1], [0], [0], [1], [0, 0, 1, 1], [], []>} : vector<2x16xf32>, vector<16x8xf32>, vector<2x8xf32> -> vector<2x8xf32>
    %c0_24 = arith.constant 0 : index
    %c0_25 = arith.constant 0 : index
    %c0_26 = arith.constant 0 : index
    %30 = vector.load %arg3[%c0_24, %c0_25, %c0_26] : memref<2x8x8xf32, #tpu.memory_space<vmem>>, vector<2x1x8xf32>
    %31 = vector.shape_cast %30 : vector<2x1x8xf32> to vector<2x8xf32>
    %32 = vector.shape_cast %29 : vector<2x8xf32> to vector<2x1x8xf32>
    tpu.vector_store %arg3[%c0_24, %c0_25, %c0_26], %32 {strides = array<i32>} : memref<2x8x8xf32, #tpu.memory_space<vmem>>, vector<2x1x8xf32>,
    return
  }
  func.func @transform_0(%arg0: i32) -> (i32, i32, i32) {
    %c0_i32 = arith.constant 0 : i32
    %c0_i32_0 = arith.constant 0 : i32
    %c0_i32_1 = arith.constant 0 : i32
    return %arg0, %c0_i32, %c0_i32_0 : i32, i32, i32
  }
  func.func @transform_1(%arg0: i32) -> (i32, i32) {
    %c0_i32 = arith.constant 0 : i32
    %c0_i32_0 = arith.constant 0 : i32
    %c0_i32_1 = arith.constant 0 : i32
    return %c0_i32, %c0_i32_0 : i32, i32
  }
  func.func @transform_2(%arg0: i32) -> (i32, i32, i32) {
    %c0_i32 = arith.constant 0 : i32
    %c0_i32_0 = arith.constant 0 : i32
    %c0_i32_1 = arith.constant 0 : i32
    return %arg0, %c0_i32, %c0_i32_0 : i32, i32, i32
  }
}

</mosaic_0001>

<bundles_post_ra>
// kernel: tpu_custom_call.1
= control target key start
LH: loop header
LB: loop body
LE: loop exit
PB: predicated region body
PF: predicated region fallthrough
CT: control target
= control target key end

     0   :  { %7 = vsyncpa [#allocation3], 0  ;;  %s1336_s0 = inlined_call_operand.hbm [shape: f32[8,16,16], index: 0, kind: input, shape index: {}]   ;;  %s1337_s1 = inlined_call_operand.vmem [shape: f32[16,8], index: 1, kind: input, shape index: {}]   ;;  %s1338_s2 = inlined_call_operand.hbm [shape: f32[8,8,8], index: 2, kind: output, shape index: {}]  }
   0x1   :  { %9 = vsyncpa [#allocation3 + $0x1], 0 }
   0x2   :  { %10 = vsyncpa [#allocation4], 0 }
   0x3   :  { %12 = vsyncpa [#allocation4 + $0x1], 0  ;;  %s1095_s9 = smov 0   ;;  %s1097_s10 = smov 0  }
   0x4   :  { %s1099_s11 = smov 0   ;;  %s1101_s12 = smov 0  }
   0x5 LB: > { %s1116_s13 = sadd.s32 4294967295, %s1068_s12   ;;  %s861_s14 = sadd.s32 4294967294, %s1068_s12   ;;  %s1068_s12 = sphi %s1101_s12, %s1350_s12   ;;  %s1064_s11 = sphi %s1099_s11, %s1349_s11   ;;  %s1060_s10 = sphi %s1097_s10, %s1348_s10   ;;  %s1056_s9 = sphi %s1095_s9, %s1347_s9  }
   0x6   : > { %s1120_s15 = sadd.s32 1, %s1068_s12   ;;  %s25_s16 = sadd.s32 1, %s1064_s11 }
   0x7   : > { %s22_s17 = ssub.s32 %s1068_s12, %s1120_s15  ;;  %p32_p0 = scmp.ne.s32.totalorder %s1064_s11, %s1060_s10 }
   0x8   : > { %p23_p1 = scmp.eq.s32.totalorder %s22_s17, 0  ;;  %p33_p2 = scmp.eq.s32.totalorder %s1068_s12, 0 }
   0x9   : > { %p38_p3 = scmp.ne.s32.totalorder %s1060_s10, %s1056_s9  ;;  %p39_p4 = scmp.eq.s32.totalorder %s1116_s13, 0 }
   0xa   : > { %s1132_s18 = scalar_select %p23_p1, %s1064_s11, %s25_s16  }
   0xb   : > { %p1134_p5 = por %p33_p2, %p32_p0  ;;  %p1138_p6 = por %p39_p4, %p38_p3 }
   0xc   : > { %p83_p7 = scmp.eq.s32.totalorder %s1116_s13, 3  ;;  %p89_p8 = scmp.eq.s32.totalorder %s861_s14, 3 }
   0xd   : > { %p930_p9 = scmp.lt.s32.totalorder %s1068_s12, 4  ;;  %s112_s23 = sand.u32 1, %s1064_s11  }
   0xe   : > { %p1144_p10 = por %p83_p7, %p32_p0  ;;  %p1148_p11 = por %p89_p8, %p38_p3 }
   0xf   : > { %s888_s24 = sshll.u32 %s1068_s12, 9  ;;  %s864_s25 = sshll.u32 %s112_s23, 5 }
  0x10   : > { %s1342_s21 = scalar_select %p1144_p10, 1, 0 }
  0x11   : > { %s1343_s22 = scalar_select %p1148_p11, 1, 0 }
  0x12   : > { %s1157_s28 = scalar_lea.hbm %s1336_s0, %s888_s24  ;;  %s116_s29 = scalar_lea.vmem [#allocation2], %s864_s25 }
  0x13   : > { %s124_s30 = sshll.u32 %s116_s29, 4  ;;  %p1161_p12 = pnand %p930_p9, %p1134_p5  ;;  %s1165_s30 = int_to_ptr.vmem [resolvable:$true] %s124_s30 }
  0x14   : > { %s1167_s4 = scalar_lea.sflag [#allocation3], %s112_s23  ;;  %s972_s5 = scalar_lea.hbm %s1157_s28, 512 }
  0x15   : > { %p973_p13 = scmp.ne.s32.totalorder %s1157_s28, %s972_s5  ;;  %p974_p0 = pneg %p1161_p12 }
  0x16   : > { %s977_s8 = scalar_lea.hbm %s1336_s0, 2048  ;;  %p978_p3 = scmp.lt.u32.totalorder %s1157_s28, %s1336_s0 }
  0x17   : > { %p975_p1 = pnand %p974_p0, %p973_p13  ;;  %p979_p4 = scmp.lt.u32.totalorder %s977_s8, %s972_s5 }
  0x18   : > { %p981_p7 = scmp.lt.u32.totalorder %s972_s5, %s1157_s28 }
  0x19   : > { %p976_p2 = pneg %p975_p1  ;;  %p980_p5 = por %p979_p4, %p978_p3 }
  0x1b   : > { %p982_p8 = por %p981_p7, %p980_p5 }
  0x1d   : > { %p983_p9 = pnand %p982_p8, %p976_p2 }
  0x1f   : > { %986 = shalt.err (!%p983_p9)
}
  0x20   : > { %s987_s17 = scalar_lea.vmem %s1165_s30, 512  ;;  %s1070_s19 = smov [#allocation2]  }
  0x21   : > { %p988_p13 = scmp.ne.s32.totalorder %s1165_s30, %s987_s17  ;;  %s992_s23 = sshll.u32 %s1070_s19, 4  ;;  %s993_s23 = int_to_ptr.vmem [resolvable:$false] %s992_s23 }
  0x22   : > { %s994_s24 = scalar_lea.vmem %s993_s23, 1024  ;;  %p995_p10 = scmp.lt.s32.totalorder %s1165_s30, %s993_s23 }
  0x23   : > { %p990_p1 = pnand %p988_p13, %p974_p0  ;;  %p996_p3 = scmp.lt.s32.totalorder %s994_s24, %s987_s17 }
  0x25   : > { %p991_p11 = pneg %p990_p1  ;;  %p997_p4 = por %p996_p3, %p995_p10 }
  0x27   : > { %p998_p5 = pnand %p997_p4, %p991_p11 }
  0x29   : > { %1001 = shalt.err (!%p998_p5)
}
  0x2a   : > { %s1071_s25 = smov 128   ;;  %s1072_s26 = smov 8  }
  0x2b   : > { %925 = dma.hbm_to_vmem [thread:$0]  (!%p1161_p12), %s1157_s28, 512, %s1165_s30, %s1167_s4, %s1071_s25, %s1071_s25, %s1072_s26  }
  0x2c   : > { %p868_p0 = scmp.ge.s32.totalorder %s1068_s12, 1  ;;  %p132_p2 = scmp.lt.s32.totalorder %s1068_s12, 5 }
  0x2e   : > { %p133_p7 = pnand %p868_p0, %p132_p2 }
  0x2f   : > { %s1198_s27 = sand.u32 (!%p133_p7), 1, %s1060_s10  }
  0x30   : > { %136 = sbr.rel (%p133_p7) target bundleno = 333 (0x14d), region = 28  ;;  %s869_s29 = sshll.u32 (!%p133_p7), %s1198_s27, 5 }
  0x31   : > { %s139_s5 = scalar_lea.sflag (!%p133_p7), [#allocation3], %s1198_s27  ;;  %s1202_s6 = scalar_lea.vmem (!%p133_p7), [#allocation2], %s869_s29 }
  0x37   : > { %1047 = dma.done.wait (%p1138_p6), %s139_s5, 512  }
  0x38   : > { %1049 = vsyncadd (%p1138_p6), %s139_s5, 4294966784  ;;  %v1073_v0 = vmov 0.0|0.0   ;;  %vm1074_vm0 = vmmov 0   ;;  %v1075_v1 = vmov 0.0   ;;  %v197_v2 = vlaneseq  ;;  %v165_v5 = vld [vmem:[%s1337_s1] sm:$0xff]  ;;  %v166_v6 = vld [vmem:[%s1337_s1 + $0x8] sm:$0xff] }
  0x39   : > { %915 = vmatprep.subr.bf16.mxu1 %v1073_v0  ;;  %908 = vmatprep.mubr.msk.f32.mxu1 %vm1074_vm0, %v1075_v1  ;;  %v1076_v3 = vmov 1966171168   ;;  %v871_v7 = vld [vmem:[%s1202_s6 + $0x1] ss:$2 sm:$0x7f]  ;;  %v911_v9 = vpack.c.bf16 %v166_v6, %v165_v5  ;;  %vm672_vm1 = vcmask 1041409  }
  0x3a   : > { %v195_v4 = vunpack.c.l.s4 %v1076_v3  ;;  %v198_v8 = vshrl.u32 %v197_v2, 7  ;;  %v872_v10 = vld [vmem:[%s1202_s6 + $0x11] ss:$2 sm:$0x7f]  ;;  %v171_v11 = vmul.f32 0.25, %v871_v7  ;;  %vm378_vm2 = vcmask 130048  }
  0x3b   : > { %v657_v13 = vld [vmem:[%s1202_s6] sm:$0x1]  ;;  %v172_v14 = vmul.f32 0.25, %v872_v10  ;;  %v873_v15 = vld [vmem:[%s1202_s6 + $0x2] ss:$2 sm:$0x7f]  ;;  %912 = vmatprep.subr.bf16.mxu0 %v911_v9  ;;  %917 = vmatpush3.bf16.msra.mxu1 %v911_v9 }
  0x3c   : > { %v196_v12 = vunpack.c.0.s8 %v195_v4  ;;  %v658_v16 = vld [vmem:[%s1202_s6 + $0x10] sm:$0x1]  ;;  %v874_v17 = vld [vmem:[%s1202_s6 + $0x12] ss:$2 sm:$0x7f]  ;;  %v179_v18 = vmul.f32 0.5, %v873_v15  ;;  %914 = vmatpush3.bf16.msra.mxu0 %v911_v9 }
  0x3d   : > { %v659_v19 = vmul.f32 0.5, %v657_v13  ;;  %v660_v20 = vmul.f32 0.5, %v658_v16  ;;  %v180_v21 = vmul.f32 0.5, %v874_v17  ;;  %v875_v22 = vld [vmem:[%s1202_s6 + $0x3] ss:$2 sm:$0x7f] }
  0x3e   : > { %v663_v23 = vld [vmem:[%s1202_s6 + $0x1] sm:$0x1]  ;;  %v181_v24 = vadd.f32 %v179_v18, %v171_v11  ;;  %v876_v25 = vld [vmem:[%s1202_s6 + $0x13] ss:$2 sm:$0x7f]  ;;  %v187_v26 = vmul.f32 0.25, %v875_v22  ;;  %v1223_v27 = vsub.s32 %v196_v12, %v198_v8 }
  0x3f   : > { %v664_v28 = vld [vmem:[%s1202_s6 + $0x11] sm:$0x1]  ;;  %v182_v29 = vadd.f32 %v180_v21, %v172_v14  ;;  %v188_v30 = vmul.f32 0.25, %v876_v25  ;;  %v665_v31 = vmul.f32 0.25, %v663_v23  ;;  %s870_s4 = sshll.u32 %s1198_s27, 4  ;;  %vm771_vm3 = vcmask 57344  }
  0x40   : > { %v666_v32 = vmul.f32 0.25, %v664_v28  ;;  %v189_v33 = vadd.f32 %v187_v26, %v181_v24  ;;  %s1256_s7 = scalar_lea.vmem [#allocation5], %s870_s4  ;;  %s889_s14 = sshll.u32 %s1116_s13, 8  ;;  %vm654_vm4 = vcmask 63488  }
  0x41   : > { %v190_v34 = vadd.f32 %v188_v30, %v182_v29  ;;  %v667_v35 = vadd.f32 %v665_v31, %v659_v19  ;;  %s788_s8 = sshll.u32 %s1256_s7, 4  ;;  %s1291_s19 = scalar_lea.hbm %s1338_s2, %s889_s14  ;;  %s1286_s8 = int_to_ptr.vmem [resolvable:$true] %s788_s8 }
  0x42   : > { %v668_v36 = vadd.f32 %v666_v32, %v660_v20  ;;  %v193_v37 = vcombine.high %v189_v33, %v189_v33  ;;  %v200_v38 = vrot.slane %v189_v33, %v1223_v27  ;;  %s775_s13 = scalar_lea.sflag [#allocation4], %s1198_s27  ;;  %s1002_s23 = scalar_lea.vmem %s1286_s8, 256 }
  0x43   : > { %v241_v39 = vcombine.high %v190_v34, %v190_v34  ;;  %v248_v40 = vrot.slane %v190_v34, %v1223_v27  ;;  %p1003_p6 = scmp.ne.s32.totalorder %s1286_s8, %s1002_s23  ;;  %p1345_p10 = scmp.ne.s32.totalorder %s1342_s21, 0 }
  0x44   : > { %v671_v41 = vrot.slane %v668_v36, 7  ;;  %v207_v42 = vrot.slane %v193_v37, %v1223_v27  ;;  %v208_v43 = vcombine.high %v200_v38, %v200_v38  ;;  %v216_v44 = vrot.slane %v200_v38, %v1223_v27  ;;  %s1077_s24 = smov [#allocation5]  }
  0x45   : > { %v256_v45 = vcombine.high %v248_v40, %v248_v40  ;;  %v264_v46 = vrot.slane %v248_v40, %v1223_v27  ;;  %v255_v47 = vrot.slane %v241_v39, %v1223_v27  ;;  %p1004_p11 = pnand %p1003_p6, %p1345_p10  ;;  %s1006_s25 = sshll.u32 %s1077_s24, 4  ;;  %s1007_s25 = int_to_ptr.vmem [resolvable:$false] %s1006_s25 }
  0x46   : > { %v673_v48 = vsel %vm672_vm1, %v671_v41, %v667_v35  ;;  %v209_v49 = vcombine.high %v207_v42, %v207_v42  ;;  %v223_v50 = vrot.slane %v207_v42, %v1223_v27  ;;  %v230_v51 = vrot.slane %v208_v43, %v1223_v27  ;;  %s1008_s26 = scalar_lea.vmem %s1007_s25, 512  ;;  %p1009_p8 = scmp.lt.s32.totalorder %s1286_s8, %s1007_s25 }
  0x47   : > { %909 = vmatmul.mubr.msk.f32.vlgmr.msra.gmra.mrb[0].mxu1 %vm378_vm2, %v673_v48  ;;  %v286_v52 = vcombine.high %v264_v46, %v264_v46  ;;  %v257_v53 = vcombine.high %v255_v47, %v255_v47  ;;  %v271_v54 = vrot.slane %v255_v47, %v1223_v27  ;;  %v278_v55 = vrot.slane %v256_v45, %v1223_v27  ;;  %p1005_p12 = pneg %p1004_p11  ;;  %p1010_p9 = scmp.lt.s32.totalorder %s1008_s26, %s1002_s23 }
  0x48   : > { %v237_v56 = vrot.slane %v209_v49, %v1223_v27  ;;  %v239_v57 = vcombine.high %v223_v50, %v223_v50  ;;  %v289_v58 = vcombine.low %v216_v44, %v230_v51  ;;  %v877_v59 = vcombine.high %v216_v44, %v230_v51 }
  0x49   : > { %v285_v60 = vrot.slane %v257_v53, %v1223_v27  ;;  %v287_v61 = vcombine.high %v271_v54, %v271_v54  ;;  %v288_v62 = vcombine.high %v278_v55, %v278_v55  ;;  %v338_v63 = vcombine.low %v278_v55, %v286_v52  ;;  %p1011_p13 = por %p1010_p9, %p1009_p8 }
  0x4a   : > { %v291_v0 = vcombine.low %v223_v50, %v237_v56  ;;  %v292_v1 = vcombine.low %v239_v57, %v264_v46  ;;  %v299_v2 = vrot.slane %v289_v58, %v1223_v27  ;;  %v306_v3 = vrot.slane %v877_v59, %v1223_v27 }
  0x4b   : > { %v339_v4 = vcombine.low %v288_v62, %v271_v54  ;;  %v340_v5 = vcombine.low %v285_v60, %v287_v61  ;;  %v347_v6 = vrot.slane %v338_v63, %v1223_v27  ;;  %p1012_p1 = pnand %p1011_p13, %p1005_p12 }
  0x4c   : > { %v313_v7 = vrot.slane %v291_v0, %v1223_v27  ;;  %v320_v8 = vrot.slane %v292_v1, %v1223_v27  ;;  %v321_v9 = vcombine.low %v299_v2, %v306_v3 }
  0x4d   : > { %v354_v10 = vrot.slane %v339_v4, %v1223_v27  ;;  %v361_v11 = vrot.slane %v340_v5, %v1223_v27 }
  0x4e   : > { %v322_v12 = vcombine.low %v313_v7, %v320_v8  ;;  %v329_v13 = vrot.slane %v321_v9, %v1223_v27 }
  0x4f   : > { %v362_v14 = vcombine.low %v347_v6, %v354_v10  ;;  %v376_v15 = vrot.slane %v361_v11, %v1223_v27 }
  0x50   : > { %v336_v16 = vrot.slane %v322_v12, %v1223_v27 }
  0x51   : > { %v369_v17 = vrot.slane %v362_v14, %v1223_v27 }
  0x52   : > { %v337_v18 = vcombine.low %v329_v13, %v336_v16 }
  0x53   : > { %v377_v19 = vcombine.low %v369_v17, %v376_v15 }
  0x54   : > { %901 = vmatprep.mubr.msk.f32.mxu0 %vm378_vm2, %v337_v18 }
  0x55   : > { %902 = vmatmul.mubr.msk.f32.vlgmr.msra.gmra.mrb[0].mxu0 %vm378_vm2, %v377_v19 }
 0x11a   : > { %v742_v20 = vpop.f32.mrb[0].mxu1 }
 0x11b   : > { %v753_v21 = vrot.slane %v742_v20, %v1223_v27  ;;  %v910_v22 = vpop.f32.mrb[1].mxu1 }
 0x11d   : > { %v754_v23 = vcombine.high %v753_v21, %v753_v21  ;;  %v761_v24 = vrot.slane %v753_v21, %v1223_v27 }
 0x11f   : > { %v768_v25 = vrot.slane %v754_v23, %v1223_v27  ;;  %772 = vst.msk [vmem:[%s1256_s7] sm:$0x1] %vm771_vm3, %v761_v24 }
 0x121   : > { %773 = vst.msk [vmem:[%s1256_s7 + $0x8] sm:$0x1] %vm771_vm3, %v768_v25 }
 0x128   : > { %v903_v26 = vpop.f32.mrb[0].mxu0 }
 0x129   : > { %v509_v28 = vcombine.high %v903_v26, %v903_v26  ;;  %v516_v29 = vrot.slane %v903_v26, %v1223_v27  ;;  %v449_v30 = vpop.f32.mrb[1].mxu0 }
 0x12a   : > { %v460_v31 = vcombine.high %v449_v30, %v449_v30  ;;  %v467_v32 = vrot.slane %v449_v30, %v1223_v27 }
 0x12b   : > { %v523_v33 = vrot.slane %v509_v28, %v1223_v27  ;;  %v524_v34 = vcombine.high %v516_v29, %v516_v29  ;;  %v532_v35 = vrot.slane %v516_v29, %v1223_v27 }
 0x12c   : > { %v474_v36 = vrot.slane %v460_v31, %v1223_v27  ;;  %v475_v37 = vcombine.high %v467_v32, %v467_v32  ;;  %v483_v42 = vrot.slane %v467_v32, %v1223_v27 }
 0x12d   : > { %v525_v38 = vcombine.high %v523_v33, %v523_v33  ;;  %v546_v39 = vrot.slane %v524_v34, %v1223_v27  ;;  %v554_v40 = vcombine.high %v532_v35, %v532_v35  ;;  %v539_v45 = vrot.slane %v523_v33, %v1223_v27 }
 0x12e   : > { %v476_v41 = vcombine.high %v474_v36, %v474_v36  ;;  %v490_v43 = vrot.slane %v474_v36, %v1223_v27  ;;  %v497_v44 = vrot.slane %v475_v37, %v1223_v27 }
 0x12f   : > { %v553_v46 = vrot.slane %v525_v38, %v1223_v27  ;;  %v555_v47 = vcombine.high %v546_v39, %v546_v39  ;;  %v605_v52 = vcombine.low %v546_v39, %v554_v40 }
 0x130   : > { %v504_v48 = vrot.slane %v476_v41, %v1223_v27  ;;  %v506_v49 = vcombine.high %v490_v43, %v490_v43  ;;  %v556_v50 = vcombine.low %v483_v42, %v497_v44  ;;  %v880_v51 = vcombine.high %v483_v42, %v497_v44 }
 0x131   : > { %v606_v53 = vcombine.low %v555_v47, %v539_v45  ;;  %v634_v59 = vrot.slane %v553_v46, %v1223_v27  ;;  %v620_v0 = vrot.slane %v605_v52, %v1223_v27 }
 0x132   : > { %v508_v54 = vcombine.high %v504_v48, %v504_v48  ;;  %v558_v55 = vcombine.low %v490_v43, %v504_v48  ;;  %v565_v56 = vrot.slane %v556_v50, %v1223_v27  ;;  %v572_v57 = vrot.slane %v880_v51, %v1223_v27 }
 0x133   : > { %v627_v58 = vrot.slane %v606_v53, %v1223_v27  ;;  %v586_v61 = vrot.slane %v506_v49, %v1223_v27 }
 0x134   : > { %v579_v60 = vrot.slane %v558_v55, %v1223_v27  ;;  %v587_v62 = vcombine.low %v565_v56, %v572_v57  ;;  %v604_v63 = vcombine.low %v508_v54, %v532_v35 }
 0x135   : > { %v636_v1 = vcombine.low %v627_v58, %v634_v59 }
 0x136   : > { %v588_v2 = vcombine.low %v579_v60, %v586_v61  ;;  %v613_v3 = vrot.slane %v604_v63, %v1223_v27  ;;  %v595_v4 = vrot.slane %v587_v62, %v1223_v27 }
 0x137   : > { %v650_v7 = vrot.slane %v636_v1, %v1223_v27 }
 0x138   : > { %v602_v5 = vrot.slane %v588_v2, %v1223_v27  ;;  %v635_v6 = vcombine.low %v613_v3, %v620_v0 }
 0x13a   : > { %v603_v8 = vcombine.low %v595_v4, %v602_v5  ;;  %v643_v9 = vrot.slane %v635_v6, %v1223_v27 }
 0x13c   : > { %v651_v10 = vcombine.low %v643_v9, %v650_v7  ;;  %655 = vst.msk [vmem:[%s1256_s7 + $0x1] sm:$0x7f] %vm654_vm4, %v603_v8 }
 0x13e   : > { %656 = vst.msk [vmem:[%s1256_s7 + $0x9] sm:$0x7f] %vm654_vm4, %v651_v10 }
 0x13f   : > { %1015 = shalt.err (!%p1012_p1)
}
 0x140   : > { %s1016_s29 = scalar_lea.hbm %s1291_s19, 256  ;;  %s1020_s28 = scalar_lea.hbm %s1338_s2, 1024 }
 0x141   : > { %p1017_p3 = scmp.ne.s32.totalorder %s1291_s19, %s1016_s29  ;;  %p1021_p0 = scmp.lt.u32.totalorder %s1291_s19, %s1338_s2 }
 0x142   : > { %p1022_p2 = scmp.lt.u32.totalorder %s1020_s28, %s1016_s29  ;;  %p1024_p6 = scmp.lt.u32.totalorder %s1016_s29, %s1291_s19 }
 0x143   : > { %p1018_p4 = pnand %p1017_p3, %p1345_p10 }
 0x144   : > { %p1023_p7 = por %p1022_p2, %p1021_p0 }
 0x145   : > { %p1019_p5 = pneg %p1018_p4 }
 0x146   : > { %p1025_p11 = por %p1024_p6, %p1023_p7 }
 0x148   : > { %p1026_p12 = pnand %p1025_p11, %p1019_p5 }
 0x14a   : > { %1029 = shalt.err (!%p1026_p12)
}
 0x14b   : > { %s1078_s3 = smov 128   ;;  %s1079_s4 = smov 8  }
 0x14c   : > { %920 = dma.vmem_to_hbm [thread:$0]  (%p1345_p10), %s1286_s8, 256, %s1291_s19, %s775_s13, %s1078_s3, %s1078_s3, %s1079_s4  }
 0x14d PF: > { %p931_p8 = scmp.ge.s32.totalorder %s1068_s12, 2  ;;  %s803_s7 = sand.u32 1, %s1056_s9  }
 0x14e   : > { %p1346_p9 = scmp.ne.s32.totalorder %s1343_s22, 0  ;;  %s804_s14 = scalar_lea.sflag [#allocation4], %s803_s7 }
 0x150   : > { %p927_p13 = pnand %p931_p8, %p1346_p9 }
 0x152   : > { %1051 = dma.done.wait (!%p927_p13), %s804_s14, 256  }
 0x153   : > { %1053 = vsyncadd (!%p927_p13), %s804_s14, 4294967040  ;;  %p15_p1 = scmp.ge.s32.totalorder %s1120_s15, 6   ;;  %s1347_s9 = smov %s1060_s10 }
 0x154   : > { %s1348_s10 = smov %s1064_s11  ;;  %s1349_s11 = smov %s1132_s18 }
 0x155   : > { %s1350_s12 = smov %s1120_s15  ;;  %17 = sbr.rel (!%p15_p1) target bundleno = 5 (0x5), region = 79 }
 0x15c   :  { %809 = vsyncpa [#allocation3], 1 }
 0x15d   :  { %811 = vsyncpa [#allocation3 + $0x1], 1 }
 0x15e   :  { %812 = vsyncpa [#allocation4], 1 }
 0x15f   :  { %814 = vsyncpa [#allocation4 + $0x1], 1 }

</bundles_post_ra>
